<compile_context>
chip_gen: v7x
topology: tpu7x:2x2x1
jax: 0.10.0
libtpu: 0.0.40
codegen_flags: <defaults>
</compile_context>

<pallas_src>
import math

import jax
import jax.numpy as jnp
from jax import lax
from jax.experimental import pallas as pl
from jax.experimental.pallas import tpu as pltpu


# ---------------------------------------------------------------------------
# Weight packing — call ONCE, outside any per-timestep path.
# ---------------------------------------------------------------------------
def prepare_params(w_hx, w_hh, bias, compute_dtype=jnp.bfloat16):
    """Pre-transpose weights once (row-major MXU operands, no per-call XLA transpose).

    compute_dtype=bf16 (default) is the throughput path: bf16 MXU operands with f32
    accumulation and an f32 bias/ReLU epilogue.  Pass jnp.float32 for full accuracy
    (the f32 hidden-state carry is used in the recurrence either way)."""
    size_out, size_in = w_hx.shape
    assert w_hh.shape == (size_out, size_out)
    assert bias.shape == (size_out,)
    return {
        "w_hx_t": jnp.transpose(w_hx).astype(compute_dtype),    # (size_in,  size_out)
        "w_hh_t": jnp.transpose(w_hh).astype(compute_dtype),    # (size_out, size_out)
        "bias_2d": bias.reshape(1, size_out).astype(jnp.float32),  # f32 epilogue
        "size_in": size_in,
        "size_out": size_out,
        "compute_dtype": compute_dtype,
    }


def _pick_row_tile(m, candidates=(512, 256, 128)):
    for c in candidates:
        if m % c == 0:
            return c
    return m  # small / ragged M -> full residency


def _pick_time_chunk(total, target):
    c = max(1, min(total, target))
    while total % c:
        c -= 1
    return c


def _vmem_budget(tc, bt, n, w_itemsize, out_itemsize):
    xw_bytes = 2 * tc * bt * n * 4               # double-buffered xw chunk (f32)
    out_bytes = 2 * tc * bt * n * out_itemsize   # double-buffered output chunk
    whh_bytes = n * n * w_itemsize               # resident W_hh^T
    misc = bt * n * (4 + w_itemsize) + (1 << 20)
    budget = 2 * (xw_bytes + out_bytes + whh_bytes + misc)
    return int(min(max(budget, 8 << 20), 64 << 20))  # clamp to v7x 64 MiB VMEM


# ---------------------------------------------------------------------------
# Kernel 1: hoisted input projection  xw = x @ W_hx^T + bias  (one big matmul)
# ---------------------------------------------------------------------------
def _input_proj_kernel(x_ref, w_ref, b_ref, o_ref):
    x = x_ref[...].astype(w_ref.dtype)            # in-kernel cast (bf16 path is free)
    acc = jnp.dot(x, w_ref[...], preferred_element_type=jnp.float32)
    o_ref[...] = (acc + b_ref[...]).astype(o_ref.dtype)


def _input_projection(x2d, params):
    """(M, size_in) @ (size_in, size_out) + bias -> (M, size_out) f32."""
    m, size_in = x2d.shape
    n = params["size_out"]
    tm = _pick_row_tile(m)
    return pl.pallas_call(
        _input_proj_kernel,
        out_shape=jax.ShapeDtypeStruct((m, n), jnp.float32),  # f32 feeds f32 recurrence
        grid=(m // tm,),
        in_specs=[
            pl.BlockSpec((tm, size_in), lambda i: (i, 0)),
            pl.BlockSpec((size_in, n), lambda i: (0, 0)),     # resident weight
            pl.BlockSpec((1, n), lambda i: (0, 0)),           # resident bias
        ],
        out_specs=pl.BlockSpec((tm, n), lambda i: (i, 0)),
        compiler_params=pltpu.CompilerParams(dimension_semantics=("parallel",)),
    )(x2d, params["w_hx_t"], params["bias_2d"])


# ---------------------------------------------------------------------------
# Kernel 2: time-chunked recurrence  h_t = ReLU(xw_t + h_{t-1} @ W_hh^T)
# ---------------------------------------------------------------------------
def _make_seq_kernel(tc_steps):
    def kernel(xw_ref, h0_ref, w_hh_ref, o_ref, h_scr):
        @pl.when(pl.program_id(1) == 0)           # first time chunk of this batch tile
        def _():
            h_scr[...] = h0_ref[...].astype(jnp.float32)

        w_hh = w_hh_ref[...]                      # resident weight, load hoisted

        def step(t, h):                           # h: f32 carry, stays in vregs
            hw = jnp.dot(h.astype(w_hh.dtype), w_hh,
                         preferred_element_type=jnp.float32)
            h_new = jnp.maximum(xw_ref[t] + hw, 0.0)   # f32 epilogue (bias already in xw)
            o_ref[t] = h_new.astype(o_ref.dtype)
            return h_new

        h_scr[...] = lax.fori_loop(0, tc_steps, step, h_scr[...], unroll=True)

    return kernel


def rnn_layer_sequence(x_seq, h0, params, out_dtype=None, time_chunk=16,
                       batch_tiles=1):
    """Apply the RNN cell over a (T, B, size_in) sequence; returns (T, B, size_out)
    of all hidden states.  x @ W_hx^T + bias is hoisted into one big matmul; the
    recurrence streams that result in time chunks with W_hh resident in VMEM."""
    t_total, batch, size_in = x_seq.shape
    n = params["size_out"]
    assert size_in == params["size_in"]
    assert h0.shape == (batch, n)
    assert batch % batch_tiles == 0
    out_dtype = out_dtype or x_seq.dtype

    # 1) Hoisted, well-shaped projection over M = T*B rows (one MXU-friendly matmul).
    xw = _input_projection(x_seq.reshape(t_total * batch, size_in), params)
    xw = xw.reshape(t_total, batch, n)

    # 2) Chunked recurrence.
    tc = _pick_time_chunk(t_total, time_chunk)
    bt = batch // batch_tiles
    w_isz = jnp.dtype(params["compute_dtype"]).itemsize
    o_isz = jnp.dtype(out_dtype).itemsize

    # TODO(synk): for size_out >> 128 on v6e/v7x, additionally tile N in 256-wide
    # column blocks so W_hh presents full 256 columns to the MXU.
    return pl.pallas_call(
        _make_seq_kernel(tc),
        out_shape=jax.ShapeDtypeStruct((t_total, batch, n), out_dtype),
        grid=(batch_tiles, t_total // tc),
        in_specs=[
            pl.BlockSpec((tc, bt, n), lambda b, t: (t, b, 0)),   # xw chunk, streamed
            pl.BlockSpec((bt, n), lambda b, t: (b, 0)),          # h0 (read at t==0)
            pl.BlockSpec((n, n), lambda b, t: (0, 0)),           # resident W_hh^T
        ],
        out_specs=pl.BlockSpec((tc, bt, n), lambda b, t: (t, b, 0)),
        scratch_shapes=[pltpu.VMEM((bt, n), jnp.float32)],       # f32 carry across chunks
        compiler_params=pltpu.CompilerParams(
            dimension_semantics=("parallel", "arbitrary"),       # batch || , time serial
            vmem_limit_bytes=_vmem_budget(tc, bt, n, w_isz, o_isz)),
    )(xw, h0, params["w_hh_t"])


# ---------------------------------------------------------------------------
# Kernel 3: single step  ReLU(x @ W_hx^T + bias + h @ W_hh^T)
#   (matches RNNLayerTorch.forward exactly; no wrapper-side concat)
# ---------------------------------------------------------------------------
def _rnn_step_kernel(x_ref, h_ref, w_hx_ref, w_hh_ref, b_ref, o_ref):
    x = x_ref[...].astype(w_hx_ref.dtype)
    h = h_ref[...].astype(w_hh_ref.dtype)
    xw = jnp.dot(x, w_hx_ref[...], preferred_element_type=jnp.float32)
    hw = jnp.dot(h, w_hh_ref[...], preferred_element_type=jnp.float32)
    o_ref[...] = jnp.maximum(xw + hw + b_ref[...], 0.0).astype(o_ref.dtype)


def rnn_layer_forward(x, hidden_state, params, out_dtype=None):
    batch, size_in = x.shape
    n = params["size_out"]
    assert size_in == params["size_in"]
    assert hidden_state.shape == (batch, n)
    out_dtype = out_dtype or x.dtype

    full = lambda shape: pl.BlockSpec(shape, lambda: (0,) * len(shape))

    # TODO(synk): for non-toy sizes, tile (M, N, K) with 128/256 blocks, an f32 VMEM
    # accumulator, pl.when init/finalize and ("parallel","parallel","arbitrary").
    return pl.pallas_call(
        _rnn_step_kernel,
        out_shape=jax.ShapeDtypeStruct((batch, n), out_dtype),
        grid=(),
        in_specs=[
            full((batch, size_in)),
            full((batch, n)),
            full((size_in, n)),
            full((n, n)),
            full((1, n)),
        ],
        out_specs=full((batch, n)),
    )(x, hidden_state, params["w_hx_t"], params["w_hh_t"], params["bias_2d"])


# ---------------------------------------------------------------------------
# Init mirroring the PyTorch module (kaiming_uniform with a=sqrt(5)).
# ---------------------------------------------------------------------------
def init_params(key, size_in, size_out, dtype=jnp.float32):
    k_hx, k_hh, k_b = jax.random.split(key, 3)
    bound_hx = 1.0 / math.sqrt(size_in)    # fan_in of w_hx
    bound_hh = 1.0 / math.sqrt(size_out)   # fan_in of w_hh
    w_hx = jax.random.uniform(k_hx, (size_out, size_in), dtype,
                              minval=-bound_hx, maxval=bound_hx)
    w_hh = jax.random.uniform(k_hh, (size_out, size_out), dtype,
                              minval=-bound_hh, maxval=bound_hh)
    bias = jax.random.uniform(k_b, (size_out,), dtype,
                              minval=-bound_hx, maxval=bound_hx)
    return w_hx, w_hh, bias


if __name__ == "__main__":
    key = jax.random.PRNGKey(0)
    k_params, k_x, k_h, k_seq = jax.random.split(key, 4)

    # Small demo shapes; size_out=128 keeps the output lane-dense.
    # TODO(synk): real workloads should fill MXU M (>=128 rows, or many sequences
    # stacked on the batch axis) and use batch_tiles=2 on v7x for dual-TC sharding.
    batch, size_in, size_out, T = 8, 32, 128, 8
    w_hx, w_hh, bias = init_params(k_params, size_in, size_out)

    x = jax.random.normal(k_x, (batch, size_in), jnp.float32)
    h0 = jax.random.normal(k_h, (batch, size_out), jnp.float32)
    x_seq = jax.random.normal(k_seq, (T, batch, size_in), jnp.float32)

    hi = jax.lax.Precision.HIGHEST
    ref_step = jnp.maximum(jnp.dot(x, w_hx.T, precision=hi) + bias
                           + jnp.dot(h0, w_hh.T, precision=hi), 0.0)

    # --- f32 path (accuracy) -------------------------------------------------
    p32 = prepare_params(w_hx, w_hh, bias, compute_dtype=jnp.float32)

    out = jax.block_until_ready(rnn_layer_forward(x, h0, p32))
    assert out.shape == (batch, size_out)
    assert jnp.allclose(out, ref_step, atol=2e-4, rtol=2e-4)

    out_seq = jax.block_until_ready(
        rnn_layer_sequence(x_seq, h0, p32, time_chunk=4))
    assert out_seq.shape == (T, batch, size_out)
    h_ref = h0
    for t in range(T):
        h_ref = jnp.maximum(jnp.dot(x_seq[t], w_hx.T, precision=hi) + bias
                            + jnp.dot(h_ref, w_hh.T, precision=hi), 0.0)
        assert jnp.allclose(out_seq[t], h_ref, atol=2e-3, rtol=2e-3)

    # --- bf16 throughput path (default): bf16 operands, f32 accumulation ------
    pbf = prepare_params(w_hx, w_hh, bias)   # compute_dtype defaults to bf16

    out_bf = jax.block_until_ready(
        rnn_layer_forward(x, h0, pbf, out_dtype=jnp.float32))
    assert jnp.allclose(out_bf, ref_step, atol=5e-2, rtol=5e-2)

    out_seq_bf = jax.block_until_ready(
        rnn_layer_sequence(x_seq, h0, pbf, out_dtype=jnp.float32, time_chunk=4))
    assert out_seq_bf.shape == (T, batch, size_out)
    # bf16 carry rounds each step; loose bound vs the f32 kernel over T steps.
    assert float(jnp.max(jnp.abs(out_seq_bf - out_seq))) < 0.25

    print("KERNEL_OK")
</pallas_src>

<mosaic_0001>
module attributes {stable_mosaic.version = 11 : i64} {
  func.func @_rnn_step_kernel(%arg0: memref<8x32xf32, #tpu.memory_space<vmem>>, %arg1: memref<8x128xf32, #tpu.memory_space<vmem>>, %arg2: memref<32x128xf32, #tpu.memory_space<vmem>>, %arg3: memref<128x128xf32, #tpu.memory_space<vmem>>, %arg4: memref<1x128xf32, #tpu.memory_space<vmem>>, %arg5: memref<8x128xf32, #tpu.memory_space<vmem>>) attributes {dimension_semantics = [], scalar_prefetch = 0 : i64, scratch_operands = 0 : i64, tpu.core_type = #tpu.core_type<tc>} {
    %c0 = arith.constant 0 : index
    %c0_0 = arith.constant 0 : index
    %0 = vector.load %arg0[%c0, %c0_0] : memref<8x32xf32, #tpu.memory_space<vmem>>, vector<8x32xf32>
    %c0_1 = arith.constant 0 : index
    %c0_2 = arith.constant 0 : index
    %1 = vector.load %arg1[%c0_1, %c0_2] : memref<8x128xf32, #tpu.memory_space<vmem>>, vector<8x128xf32>
    %c0_3 = arith.constant 0 : index
    %c0_4 = arith.constant 0 : index
    %2 = vector.load %arg2[%c0_3, %c0_4] : memref<32x128xf32, #tpu.memory_space<vmem>>, vector<32x128xf32>
    %cst = arith.constant dense<0.000000e+00> : vector<8x128xf32>
    %3 = tpu.matmul %0, %2, %cst {dimension_numbers = #tpu.dot_dimension_numbers<[1], [0], [0], [1], [0, 0, 1, 1], [], []>} : vector<8x32xf32>, vector<32x128xf32>, vector<8x128xf32> -> vector<8x128xf32>
    %c0_5 = arith.constant 0 : index
    %c0_6 = arith.constant 0 : index
    %4 = vector.load %arg3[%c0_5, %c0_6] : memref<128x128xf32, #tpu.memory_space<vmem>>, vector<128x128xf32>
    %cst_7 = arith.constant dense<0.000000e+00> : vector<8x128xf32>
    %5 = tpu.matmul %1, %4, %cst_7 {dimension_numbers = #tpu.dot_dimension_numbers<[1], [0], [0], [1], [0, 0, 1, 1], [], []>} : vector<8x128xf32>, vector<128x128xf32>, vector<8x128xf32> -> vector<8x128xf32>
    %6 = arith.addf %3, %5 : vector<8x128xf32>
    %c0_8 = arith.constant 0 : index
    %c0_9 = arith.constant 0 : index
    %7 = vector.load %arg4[%c0_8, %c0_9] : memref<1x128xf32, #tpu.memory_space<vmem>>, vector<1x128xf32>
    %8 = vector.broadcast %7 : vector<1x128xf32> to vector<8x128xf32>
    %9 = arith.addf %6, %8 : vector<8x128xf32>
    %cst_10 = arith.constant 0.000000e+00 : f32
    %10 = vector.broadcast %cst_10 : f32 to vector<8x128xf32>
    %11 = arith.maximumf %9, %10 : vector<8x128xf32>
    %c0_11 = arith.constant 0 : index
    %c0_12 = arith.constant 0 : index
    %12 = vector.load %arg5[%c0_11, %c0_12] : memref<8x128xf32, #tpu.memory_space<vmem>>, vector<8x128xf32>
    tpu.vector_store %arg5[%c0_11, %c0_12], %11 {strides = array<i32>} : memref<8x128xf32, #tpu.memory_space<vmem>>, vector<8x128xf32>,
    return
  }
}

</mosaic_0001>

<bundles_post_ra>
// kernel: tpu_custom_call.1
= control target key start
LH: loop header
LB: loop body
LE: loop exit
PB: predicated region body
PF: predicated region fallthrough
CT: control target
= control target key end

     0   :  { %10 = vsyncpa [#allocation3], 0  ;;  %s596_s0 = inlined_call_operand.hbm [shape: f32[8,32], index: 0, kind: input, shape index: {}]   ;;  %s597_s1 = inlined_call_operand.hbm [shape: f32[8,128], index: 1, kind: input, shape index: {}]   ;;  %s598_s2 = inlined_call_operand.hbm [shape: f32[32,128], index: 2, kind: input, shape index: {}]   ;;  %s599_s3 = inlined_call_operand.hbm [shape: f32[128,128], index: 3, kind: input, shape index: {}]   ;;  %s600_s4 = inlined_call_operand.vmem [shape: f32[1,128], index: 4, kind: input, shape index: {}]   ;;  %s601_s5 = inlined_call_operand.hbm [shape: f32[8,128], index: 5, kind: output, shape index: {}]  }
   0x1   :  { %11 = vsyncpa [#allocation6], 0 }
   0x2   :  { %12 = vsyncpa [#allocation9], 0 }
   0x3   :  { %13 = vsyncpa [#allocation4], 0  ;;  %s493_s18 = smov [#allocation5]   ;;  %s494_s20 = smov [#allocation2]  }
   0x4   :  { %s30_s19 = sshll.u32 %s493_s18, 4  ;;  %s20_s21 = sshll.u32 %s494_s20, 4  ;;  %s31_s19 = int_to_ptr.vmem [resolvable:$true] %s30_s19  ;;  %s21_s21 = int_to_ptr.vmem [resolvable:$true] %s20_s21 }
   0x5   :  { %s375_s24 = scalar_lea.hbm %s597_s1, 128 }
   0x6   :  { %p376_p0 = scmp.ne.s32.totalorder %s597_s1, %s375_s24  ;;  %p379_p1 = scmp.lt.u32.totalorder %s375_s24, %s597_s1 }
   0x8   :  { %p381_p2 = pnand %p379_p1, %p376_p0 }
   0xa   :  { %384 = shalt.err (!%p381_p2)
}
   0xb   :  { %s385_s29 = scalar_lea.vmem %s31_s19, 128  ;;  %p390_p4 = scmp.lt.s32.totalorder %s31_s19, %s31_s19 }
   0xc   :  { %p386_p3 = scmp.ne.s32.totalorder %s31_s19, %s385_s29  ;;  %p391_p5 = scmp.lt.s32.totalorder %s385_s29, %s385_s29 }
   0xe   :  { %p392_p6 = por %p391_p5, %p390_p4 }
  0x10   :  { %p393_p7 = pnand %p392_p6, %p386_p3 }
  0x12   :  { %396 = shalt.err (!%p393_p7)
}
  0x13   :  { %33 = dma.hbm_to_vmem [thread:$0]  %s597_s1, 128, %s31_s19, [#allocation6]  }
  0x14   :  { %s397_s9 = scalar_lea.hbm %s596_s0, 128 }
  0x15   :  { %p398_p8 = scmp.ne.s32.totalorder %s596_s0, %s397_s9  ;;  %p401_p9 = scmp.lt.u32.totalorder %s397_s9, %s596_s0 }
  0x17   :  { %p403_p10 = pnand %p401_p9, %p398_p8 }
  0x19   :  { %406 = shalt.err (!%p403_p10)
}
  0x1a   :  { %s407_s14 = scalar_lea.vmem %s21_s21, 128  ;;  %p412_p12 = scmp.lt.s32.totalorder %s21_s21, %s21_s21 }
  0x1b   :  { %p408_p11 = scmp.ne.s32.totalorder %s21_s21, %s407_s14  ;;  %p413_p13 = scmp.lt.s32.totalorder %s407_s14, %s407_s14 }
  0x1d   :  { %p414_p0 = por %p413_p13, %p412_p12 }
  0x1f   :  { %p415_p1 = pnand %p414_p0, %p408_p11 }
  0x21   :  { %418 = shalt.err (!%p415_p1)
}
  0x22   :  { %23 = dma.hbm_to_vmem [thread:$0]  %s596_s0, 128, %s21_s21, [#allocation3]  }
  0x23   :  { %s495_s16 = smov [#allocation7]   ;;  %s419_s20 = scalar_lea.hbm %s598_s2, 512 }
  0x24   :  { %s39_s17 = sshll.u32 %s495_s16, 4  ;;  %p420_p2 = scmp.ne.s32.totalorder %s598_s2, %s419_s20  ;;  %s40_s17 = int_to_ptr.vmem [resolvable:$true] %s39_s17 }
  0x25   :  { %p423_p3 = scmp.lt.u32.totalorder %s419_s20, %s598_s2 }
  0x27   :  { %p425_p4 = pnand %p423_p3, %p420_p2 }
  0x29   :  { %428 = shalt.err (!%p425_p4)
}
  0x2a   :  { %s429_s26 = scalar_lea.vmem %s40_s17, 512  ;;  %p434_p6 = scmp.lt.s32.totalorder %s40_s17, %s40_s17 }
  0x2b   :  { %p430_p5 = scmp.ne.s32.totalorder %s40_s17, %s429_s26  ;;  %p435_p7 = scmp.lt.s32.totalorder %s429_s26, %s429_s26 }
  0x2d   :  { %p436_p8 = por %p435_p7, %p434_p6 }
  0x2f   :  { %p437_p9 = pnand %p436_p8, %p430_p5 }
  0x31   :  { %440 = shalt.err (!%p437_p9)
}
  0x32   :  { %s496_s0 = smov 128   ;;  %s497_s21 = smov 8  }
  0x33   :  { %45 = dma.hbm_to_vmem [thread:$0]  %s598_s2, 512, %s40_s17, [#allocation6], %s496_s0, %s496_s0, %s497_s21  }
  0x34   :  { %s498_s29 = smov [#allocation8]   ;;  %s441_s8 = scalar_lea.hbm %s599_s3, 2048 }
  0x35   :  { %s51_s30 = sshll.u32 %s498_s29, 4  ;;  %p442_p10 = scmp.ne.s32.totalorder %s599_s3, %s441_s8  ;;  %s52_s30 = int_to_ptr.vmem [resolvable:$true] %s51_s30 }
  0x36   :  { %p445_p11 = scmp.lt.u32.totalorder %s441_s8, %s599_s3 }
  0x38   :  { %p447_p12 = pnand %p445_p11, %p442_p10 }
  0x3a   :  { %450 = shalt.err (!%p447_p12)
}
  0x3b   :  { %s451_s13 = scalar_lea.vmem %s52_s30, 2048  ;;  %p456_p0 = scmp.lt.s32.totalorder %s52_s30, %s52_s30 }
  0x3c   :  { %p452_p13 = scmp.ne.s32.totalorder %s52_s30, %s451_s13  ;;  %p457_p1 = scmp.lt.s32.totalorder %s451_s13, %s451_s13 }
  0x3e   :  { %p458_p2 = por %p457_p1, %p456_p0 }
  0x40   :  { %p459_p3 = pnand %p458_p2, %p452_p13 }
  0x42   :  { %462 = shalt.err (!%p459_p3)
}
  0x43   :  { %57 = dma.hbm_to_vmem [thread:$0]  %s599_s3, 2048, %s52_s30, [#allocation9], %s496_s0, %s496_s0, %s497_s21  }
  0x44   :  { %485 = dma.done.wait [#allocation3], 128  }
  0x45   :  { %486 = vsyncadd [#allocation3], 4294967168 }
  0x46   :  { %487 = dma.done.wait [#allocation6], 640  }
  0x47   :  { %488 = vsyncadd [#allocation6], 4294966656 }
  0x48   :  { %489 = dma.done.wait [#allocation9], 2048  }
  0x49   :  { %490 = vsyncadd [#allocation9], 4294965248  ;;  %v499_v0 = vmov 0.0|0.0   ;;  %vm500_vm0 = vmmov 0   ;;  %v501_v1 = vmov 0.0   ;;  %v78_v2 = vld [vmem:[#allocation8] sm:$0xff] }
  0x4a   :  { %335 = vmatprep.subr.bf16.mxu0 %v499_v0  ;;  %359 = vmatprep.subr.bf16.mxu1 %v499_v0  ;;  %v79_v3 = vld [vmem:[#allocation8 + $0x8] sm:$0xff]  ;;  %v80_v4 = vld [vmem:[#allocation8 + $0x10] sm:$0xff]  ;;  %v81_v6 = vld [vmem:[#allocation8 + $0x18] sm:$0xff]  ;;  %vm164_vm1 = vcmask 261120   ;;  %s502_s15 = smov [#allocation10]  }
  0x4b   :  { %332 = vmatprep.mubr.msk.f32.mxu1 %vm500_vm0, %v501_v1  ;;  %321 = vmatprep.mubr.msk.f32.mxu0 %vm500_vm0, %v501_v1  ;;  %v336_v5 = vpack.c.bf16 %v79_v3, %v78_v2  ;;  %v339_v7 = vpack.c.bf16 %v81_v6, %v80_v4  ;;  %v82_v8 = vld [vmem:[#allocation8 + $0x20] sm:$0xff]  ;;  %v83_v9 = vld [vmem:[#allocation8 + $0x28] sm:$0xff]  ;;  %v76_v13 = vld [vmem:[#allocation7 + $0x10] sm:$0xff]  ;;  %s254_s16 = sshll.u32 %s502_s15, 4  ;;  %s255_s16 = int_to_ptr.vmem [resolvable:$true] %s254_s16 }
  0x4c   :  { %v74_v10 = vld [vmem:[#allocation7] sm:$0xff]  ;;  %v75_v11 = vld [vmem:[#allocation7 + $0x8] sm:$0xff]  ;;  %v77_v14 = vld [vmem:[#allocation7 + $0x18] sm:$0xff]  ;;  %v342_v15 = vpack.c.bf16 %v83_v9, %v82_v8  ;;  %s463_s17 = scalar_lea.vmem %s255_s16, 128  ;;  %p468_p5 = scmp.lt.s32.totalorder %s255_s16, %s255_s16 }
  0x4d   :  { %337 = vmatpush3.bf16.msra.mxu0 %v336_v5  ;;  %v360_v12 = vpack.c.bf16 %v75_v11, %v74_v10  ;;  %v363_v16 = vpack.c.bf16 %v77_v14, %v76_v13  ;;  %v84_v17 = vld [vmem:[#allocation8 + $0x30] sm:$0xff]  ;;  %v85_v18 = vld [vmem:[#allocation8 + $0x38] sm:$0xff]  ;;  %v86_v21 = vld [vmem:[#allocation8 + $0x40] sm:$0xff]  ;;  %p464_p4 = scmp.ne.s32.totalorder %s255_s16, %s463_s17  ;;  %p469_p6 = scmp.lt.s32.totalorder %s463_s17, %s463_s17 }
  0x4e   :  { %338 = vmatprep.subr.bf16.mxu0 %v499_v0  ;;  %v345_v19 = vpack.c.bf16 %v85_v18, %v84_v17  ;;  %v72_v20 = vld [vmem:[#allocation2] sm:$0xff]  ;;  %v87_v22 = vld [vmem:[#allocation8 + $0x48] sm:$0xff]  ;;  %v89_v25 = vld [vmem:[#allocation8 + $0x58] sm:$0xff] }
  0x4f   :  { %361 = vmatpush3.bf16.msra.mxu1 %v360_v12  ;;  %v348_v23 = vpack.c.bf16 %v87_v22, %v86_v21  ;;  %v88_v24 = vld [vmem:[#allocation8 + $0x50] sm:$0xff]  ;;  %v90_v27 = vld [vmem:[#allocation8 + $0x60] sm:$0xff]  ;;  %v91_v28 = vld [vmem:[#allocation8 + $0x68] sm:$0xff]  ;;  %p470_p7 = por %p469_p6, %p468_p5 }
  0x50   :  { %362 = vmatprep.subr.bf16.mxu1 %v499_v0  ;;  %v351_v26 = vpack.c.bf16 %v89_v25, %v88_v24  ;;  %v354_v29 = vpack.c.bf16 %v91_v28, %v90_v27  ;;  %v92_v30 = vld [vmem:[#allocation8 + $0x70] sm:$0xff]  ;;  %v93_v31 = vld [vmem:[#allocation8 + $0x78] sm:$0xff] }
  0x51   :  { %340 = vmatpush3.bf16.msra.mxu0 %v339_v7  ;;  %v357_v32 = vpack.c.bf16 %v93_v31, %v92_v30  ;;  %v73_v33 = vld [vmem:[#allocation5] sm:$0xff]  ;;  %v266_v37 = vld [vmem:[%s600_s4] ss:$0 sm:$0xff]  ;;  %p471_p8 = pnand %p470_p7, %p464_p4 }
  0x52   :  { %341 = vmatprep.subr.bf16.mxu0 %v499_v0 }
  0x53   :  { %364 = vmatpush3.bf16.msra.mxu1 %v363_v16 }
  0x55   :  { %343 = vmatpush3.bf16.msra.mxu0 %v342_v15 }
  0x56   :  { %344 = vmatprep.subr.bf16.mxu0 %v499_v0  ;;  %333 = vmatmul.mubr.msk.f32.vlgmr.msra.gmra.mrb[0].mxu1 %vm164_vm1, %v72_v20 }
  0x59   :  { %346 = vmatpush3.bf16.msra.mxu0 %v345_v19 }
  0x5a   :  { %347 = vmatprep.subr.bf16.mxu0 %v499_v0 }
  0x5d   :  { %349 = vmatpush3.bf16.msra.mxu0 %v348_v23 }
  0x5e   :  { %350 = vmatprep.subr.bf16.mxu0 %v499_v0 }
  0x61   :  { %352 = vmatpush3.bf16.msra.mxu0 %v351_v26 }
  0x62   :  { %353 = vmatprep.subr.bf16.mxu0 %v499_v0 }
  0x65   :  { %355 = vmatpush3.bf16.msra.mxu0 %v354_v29 }
  0x66   :  { %356 = vmatprep.subr.bf16.mxu0 %v499_v0 }
  0x69   :  { %358 = vmatpush3.bf16.msra.mxu0 %v357_v32 }
  0x6c   :  { %322 = vmatmul.mubr.f32.vlgmr.msra.gmra.mrb[0].mxu0 %v73_v33 }
 0x129   :  { %v234_v34 = vpop.f32.mrb[0].mxu1 }
 0x12a   :  { %v334_v35 = vpop.f32.mrb[1].mxu1 }
 0x13f   :  { %v160_v36 = vpop.f32.mrb[0].mxu0 }
 0x140   :  { %v235_v38 = vadd.f32 %v234_v34, %v160_v36  ;;  %v323_v39 = vpop.f32.mrb[1].mxu0 }
 0x142   :  { %v245_v40 = vadd.f32 %v266_v37, %v235_v38 }
 0x144   :  { %v246_v41 = vmax.f32 %v245_v40, 0.0 }
 0x146   :  { %247 = vst [vmem:[#allocation10] sm:$0xff] %v246_v41 }
 0x147   :  { %474 = shalt.err (!%p471_p8)
}
 0x148   :  { %s475_s20 = scalar_lea.hbm %s601_s5, 128 }
 0x149   :  { %p476_p9 = scmp.ne.s32.totalorder %s601_s5, %s475_s20  ;;  %p479_p10 = scmp.lt.u32.totalorder %s475_s20, %s601_s5 }
 0x14b   :  { %p481_p11 = pnand %p479_p10, %p476_p9 }
 0x14d   :  { %484 = shalt.err (!%p481_p11)
}
 0x14e   :  { %257 = dma.vmem_to_hbm [thread:$0]  %s255_s16, 128, %s601_s5, [#allocation4]  }
 0x14f   :  { %491 = dma.done.wait [#allocation4], 128  }
 0x150   :  { %492 = vsyncadd [#allocation4], 4294967168 }
 0x151   :  { %261 = vsyncpa [#allocation3], 1 }
 0x152   :  { %262 = vsyncpa [#allocation6], 1 }
 0x153   :  { %263 = vsyncpa [#allocation9], 1 }
 0x154   :  { %264 = vsyncpa [#allocation4], 1 }

</bundles_post_ra>
